<compile_context>
chip_gen: v7x
topology: tpu7x:2x2x1
jax: 0.10.0
libtpu: 0.0.40
codegen_flags: <defaults>
</compile_context>

<pallas_src>
import math

import jax
import jax.numpy as jnp
from jax.experimental import pallas as pl
from jax.experimental.pallas import tpu as pltpu


def _round_up(n: int, m: int) -> int:
    return ((n + m - 1) // m) * m


def _pick_hidden_chunk(hidden: int, max_chunk: int) -> int:
    """Largest 128-aligned divisor of `hidden` that is <= max_chunk.

    Falls back to the full hidden dim (no chunking) when none exists, which
    keeps the lane-dim constraint (block dim == full array dim) satisfied.
    """
    if hidden <= max_chunk:
        return hidden
    start = (max_chunk // 128) * 128
    for th in range(start, 127, -128):
        if hidden % th == 0:
            return th
    return hidden


def _clip_vision_projection_kernel(x_ref, wu_ref, bu_ref, wd_ref, bd_ref,
                                   o_ref, acc_ref):
    # Block shapes for grid point (i, j):
    #   x_ref  : (TM, C_in)      row tile i            (invariant along j)
    #   wu_ref : (C_in, TH)      hidden chunk j of up weight
    #   bu_ref : (1, TH)         hidden chunk j of up bias
    #   wd_ref : (TH, C_out)     hidden chunk j of down weight
    #   bd_ref : (1, C_out)      grid-invariant
    #   o_ref  : (TM, C_out)     row tile i (written on last hidden chunk)
    #   acc_ref: (TM, C_out) f32 accumulator scratch
    j = pl.program_id(1)

    @pl.when(j == 0)
    def _init():
        acc_ref[...] = jnp.zeros_like(acc_ref)

    # Up projection chunk: MXU matmul, f32 accumulation, native-dtype inputs.
    h = jnp.dot(x_ref[...], wu_ref[...], preferred_element_type=jnp.float32)
    h = h + bu_ref[...].astype(jnp.float32)
    # SiLU in f32 (sigmoid -> EUP slot).
    h = h * jax.nn.sigmoid(h)
    # Partial down projection over this hidden chunk, accumulated in f32.
    acc_ref[...] += jnp.dot(h.astype(wd_ref.dtype), wd_ref[...],
                            preferred_element_type=jnp.float32)

    @pl.when(j == pl.num_programs(1) - 1)
    def _finalize():
        o_ref[...] = (acc_ref[...]
                      + bd_ref[...].astype(jnp.float32)).astype(o_ref.dtype)


def clip_vision_projection(x, w_up_t, b_up, w_down_t, b_down, *,
                           block_rows=512, max_hidden_chunk=1536,
                           compute_dtype=None):
    """
    x        : (..., C_in)
    w_up_t   : (C_in, 3*C_out)   -- transposed nn.Linear weight of `up`
    b_up     : (3*C_out,)
    w_down_t : (3*C_out, C_out)  -- transposed nn.Linear weight of `down`
    b_down   : (C_out,)
    compute_dtype : optional dtype (e.g. jnp.bfloat16) to cast x/weights to
                    before the kernel (v6e/v7x bf16 MXU path).
    returns  : (..., C_out)
    """
    *lead, c_in = x.shape
    hidden = w_up_t.shape[1]
    c_out = w_down_t.shape[1]
    assert w_up_t.shape[0] == c_in
    assert w_down_t.shape[0] == hidden
    assert b_up.shape == (hidden,)
    assert b_down.shape == (c_out,)

    if compute_dtype is not None:
        x = x.astype(compute_dtype)
        w_up_t = w_up_t.astype(compute_dtype)
        w_down_t = w_down_t.astype(compute_dtype)

    m = int(math.prod(lead)) if lead else 1
    x2 = x.reshape(m, c_in)
    bu2 = b_up.reshape(1, hidden)
    bd2 = b_down.reshape(1, c_out)

    # Row tile: large tiles amortize per-step overhead (mem-bound op); for
    # small M split into >=2 tiles so the "parallel" axis can shard across
    # both v7x TensorCores.  Sublane dim stays a multiple of 8.
    tm = min(block_rows, max(8, _round_up(-(-m // 2), 8)))
    n_m = pl.cdiv(m, tm)          # partial boundary tile is masked by Pallas

    # Hidden chunking bounds the live (tm, TH) intermediate and weight slices.
    th = _pick_hidden_chunk(hidden, max_hidden_chunk)
    n_h = hidden // th
    weights_invariant = (n_h == 1)

    # VMEM budget (bytes): double-buffered x/out, weight slices (single- or
    # double-buffered), accumulator, live f32 intermediate.  Used to set an
    # explicit scoped-VMEM limit (default is only 16/32 MiB).
    x_bytes = jnp.dtype(x2.dtype).itemsize
    w_bytes = jnp.dtype(w_up_t.dtype).itemsize
    wbuf = 1 if weights_invariant else 2
    est = (2 * tm * c_in * x_bytes
           + 2 * tm * c_out * x_bytes
           + wbuf * (c_in * th + th) * w_bytes
           + wbuf * th * c_out * w_bytes
           + c_out * w_bytes
           + tm * c_out * 4
           + 2 * tm * th * 4)
    vmem_limit = int(min(max(2 * est, 32 * 1024 * 1024), 100 * 1024 * 1024))

    cost = pl.CostEstimate(
        flops=2 * m * (c_in * hidden + hidden * c_out),
        transcendentals=m * hidden,
        bytes_accessed=(m * (c_in + c_out)) * x_bytes
                       + (c_in * hidden + hidden + hidden * c_out + c_out) * w_bytes,
    )

    def _run(use_buffered):
        inv_kw = {"pipeline_mode": pl.Buffered(1)} if use_buffered else {}
        w_kw = inv_kw if weights_invariant else {}
        in_specs = [
            pl.BlockSpec((tm, c_in), lambda i, j: (i, 0)),            # x rows
            pl.BlockSpec((c_in, th), lambda i, j: (0, j), **w_kw),    # up W
            pl.BlockSpec((1, th), lambda i, j: (0, j), **w_kw),       # up b
            pl.BlockSpec((th, c_out), lambda i, j: (j, 0), **w_kw),   # down W
            pl.BlockSpec((1, c_out), lambda i, j: (0, 0), **inv_kw),  # down b
        ]
        out_specs = pl.BlockSpec((tm, c_out), lambda i, j: (i, 0))
        return pl.pallas_call(
            _clip_vision_projection_kernel,
            out_shape=jax.ShapeDtypeStruct((m, c_out), x2.dtype),
            grid=(n_m, n_h),
            in_specs=in_specs,
            out_specs=out_specs,
            scratch_shapes=[pltpu.VMEM((tm, c_out), jnp.float32)],
            compiler_params=pltpu.CompilerParams(
                dimension_semantics=("parallel", "arbitrary"),
                vmem_limit_bytes=vmem_limit,
            ),
            cost_estimate=cost,
        )(x2, w_up_t, bu2, w_down_t, bd2)

    try:
        out = _run(True)
    except Exception:
        # Fallback if this JAX build rejects pl.Buffered(1) on pallas_call
        # BlockSpecs: identical math, default double buffering.
        out = _run(False)

    return out.reshape(*lead, c_out)


def _reference(x, w_up_t, b_up, w_down_t, b_down):
    xf = x.astype(jnp.float32)
    h = xf @ w_up_t.astype(jnp.float32) + b_up.astype(jnp.float32)
    h = h * jax.nn.sigmoid(h)
    out = h @ w_down_t.astype(jnp.float32) + b_down.astype(jnp.float32)
    return out.astype(x.dtype)


if __name__ == "__main__":
    # Small shapes consistent with the module: tokens of a vision encoder.
    B, S = 2, 8
    IN_CH, OUT_CH = 32, 32           # hidden = 3 * OUT_CH = 96

    key = jax.random.PRNGKey(0)
    k_x, k_wu, k_bu, k_wd, k_bd = jax.random.split(key, 5)

    x = jax.random.normal(k_x, (B, S, IN_CH), dtype=jnp.float32)
    # nn.Linear weights stored transposed so the in-kernel matmul is row @ mat.
    w_up_t = jax.random.normal(k_wu, (IN_CH, 3 * OUT_CH), dtype=jnp.float32) * 0.02
    b_up = jax.random.normal(k_bu, (3 * OUT_CH,), dtype=jnp.float32) * 0.02
    w_down_t = jax.random.normal(k_wd, (3 * OUT_CH, OUT_CH), dtype=jnp.float32) * 0.02
    b_down = jax.random.normal(k_bd, (OUT_CH,), dtype=jnp.float32) * 0.02

    out = clip_vision_projection(x, w_up_t, b_up, w_down_t, b_down)
    out = jax.block_until_ready(out)

    ref = _reference(x, w_up_t, b_up, w_down_t, b_down)
    assert out.shape == ref.shape, (out.shape, ref.shape)
    assert jnp.allclose(out, ref, atol=1e-5, rtol=1e-5)

    print("KERNEL_OK")
</pallas_src>

<mosaic_0001>
module attributes {stable_mosaic.version = 11 : i64} {
  func.func @_clip_vision_projection_kernel(%arg0: i32, %arg1: i32, %arg2: memref<8x32xf32, #tpu.memory_space<vmem>>, %arg3: memref<32x96xf32, #tpu.memory_space<vmem>>, %arg4: memref<1x96xf32, #tpu.memory_space<vmem>>, %arg5: memref<96x32xf32, #tpu.memory_space<vmem>>, %arg6: memref<1x32xf32, #tpu.memory_space<vmem>>, %arg7: memref<8x32xf32, #tpu.memory_space<vmem>>, %arg8: memref<8x32xf32, #tpu.memory_space<vmem>>) attributes {dimension_semantics = [#tpu.dimension_semantics<parallel>, #tpu.dimension_semantics<arbitrary>], iteration_bounds = array<i64: 2, 1>, scalar_prefetch = 0 : i64, scratch_operands = 1 : i64, tpu.core_type = #tpu.core_type<tc>, window_params = [{transform_indices = @transform_0, window_bounds = array<i64: 8, 32>}, {pipeline_mode = #tpu.pipeline_mode<synchronous>, transform_indices = @transform_1, window_bounds = array<i64: 32, 96>}, {pipeline_mode = #tpu.pipeline_mode<synchronous>, transform_indices = @transform_2, window_bounds = array<i64: 1, 96>}, {pipeline_mode = #tpu.pipeline_mode<synchronous>, transform_indices = @transform_3, window_bounds = array<i64: 96, 32>}, {pipeline_mode = #tpu.pipeline_mode<synchronous>, transform_indices = @transform_4, window_bounds = array<i64: 1, 32>}, {transform_indices = @transform_5, window_bounds = array<i64: 8, 32>}]} {
    %c0_i32 = arith.constant 0 : i32
    %0 = arith.cmpi eq, %arg1, %c0_i32 : i32
    %1 = arith.extui %0 : i1 to i32
    %c0_i32_0 = arith.constant 0 : i32
    %2 = arith.cmpi ne, %1, %c0_i32_0 : i32
    scf.if %2 {
      %cst_16 = arith.constant 0.000000e+00 : f32
      %23 = vector.broadcast %cst_16 : f32 to vector<8x32xf32>
      %c0_17 = arith.constant 0 : index
      %c0_18 = arith.constant 0 : index
      %24 = vector.load %arg8[%c0_17, %c0_18] : memref<8x32xf32, #tpu.memory_space<vmem>>, vector<8x32xf32>
      tpu.vector_store %arg8[%c0_17, %c0_18], %23 {strides = array<i32>} : memref<8x32xf32, #tpu.memory_space<vmem>>, vector<8x32xf32>,
    } else {
    }
    %c0 = arith.constant 0 : index
    %c0_1 = arith.constant 0 : index
    %3 = vector.load %arg2[%c0, %c0_1] : memref<8x32xf32, #tpu.memory_space<vmem>>, vector<8x32xf32>
    %c0_2 = arith.constant 0 : index
    %c0_3 = arith.constant 0 : index
    %4 = vector.load %arg3[%c0_2, %c0_3] : memref<32x96xf32, #tpu.memory_space<vmem>>, vector<32x96xf32>
    %cst = arith.constant dense<0.000000e+00> : vector<8x96xf32>
    %5 = tpu.matmul %3, %4, %cst {dimension_numbers = #tpu.dot_dimension_numbers<[1], [0], [0], [1], [0, 0, 1, 1], [], []>} : vector<8x32xf32>, vector<32x96xf32>, vector<8x96xf32> -> vector<8x96xf32>
    %c0_4 = arith.constant 0 : index
    %c0_5 = arith.constant 0 : index
    %6 = vector.load %arg4[%c0_4, %c0_5] : memref<1x96xf32, #tpu.memory_space<vmem>>, vector<1x96xf32>
    %7 = vector.broadcast %6 : vector<1x96xf32> to vector<8x96xf32>
    %8 = arith.addf %5, %7 : vector<8x96xf32>
    %9 = arith.negf %8 : vector<8x96xf32>
    %10 = math.exp %9 : vector<8x96xf32>
    %cst_6 = arith.constant 1.000000e+00 : f32
    %11 = vector.broadcast %cst_6 : f32 to vector<8x96xf32>
    %12 = arith.addf %11, %10 : vector<8x96xf32>
    %13 = arith.divf %11, %12 : vector<8x96xf32>
    %14 = arith.mulf %8, %13 : vector<8x96xf32>
    %c0_7 = arith.constant 0 : index
    %c0_8 = arith.constant 0 : index
    %15 = vector.load %arg8[%c0_7, %c0_8] : memref<8x32xf32, #tpu.memory_space<vmem>>, vector<8x32xf32>
    %c0_9 = arith.constant 0 : index
    %c0_10 = arith.constant 0 : index
    %16 = vector.load %arg5[%c0_9, %c0_10] : memref<96x32xf32, #tpu.memory_space<vmem>>, vector<96x32xf32>
    %cst_11 = arith.constant dense<0.000000e+00> : vector<8x32xf32>
    %17 = tpu.matmul %14, %16, %cst_11 {dimension_numbers = #tpu.dot_dimension_numbers<[1], [0], [0], [1], [0, 0, 1, 1], [], []>} : vector<8x96xf32>, vector<96x32xf32>, vector<8x32xf32> -> vector<8x32xf32>
    %18 = arith.addf %15, %17 : vector<8x32xf32>
    %c0_12 = arith.constant 0 : index
    %c0_13 = arith.constant 0 : index
    %19 = vector.load %arg8[%c0_12, %c0_13] : memref<8x32xf32, #tpu.memory_space<vmem>>, vector<8x32xf32>
    tpu.vector_store %arg8[%c0_12, %c0_13], %18 {strides = array<i32>} : memref<8x32xf32, #tpu.memory_space<vmem>>, vector<8x32xf32>,
    %c0_i32_14 = arith.constant 0 : i32
    %20 = arith.cmpi eq, %arg1, %c0_i32_14 : i32
    %21 = arith.extui %20 : i1 to i32
    %c0_i32_15 = arith.constant 0 : i32
    %22 = arith.cmpi ne, %21, %c0_i32_15 : i32
    scf.if %22 {
      %c0_16 = arith.constant 0 : index
      %c0_17 = arith.constant 0 : index
      %23 = vector.load %arg8[%c0_16, %c0_17] : memref<8x32xf32, #tpu.memory_space<vmem>>, vector<8x32xf32>
      %c0_18 = arith.constant 0 : index
      %c0_19 = arith.constant 0 : index
      %24 = vector.load %arg6[%c0_18, %c0_19] : memref<1x32xf32, #tpu.memory_space<vmem>>, vector<1x32xf32>
      %25 = vector.broadcast %24 : vector<1x32xf32> to vector<8x32xf32>
      %26 = arith.addf %23, %25 : vector<8x32xf32>
      %c0_20 = arith.constant 0 : index
      %c0_21 = arith.constant 0 : index
      %27 = vector.load %arg7[%c0_20, %c0_21] : memref<8x32xf32, #tpu.memory_space<vmem>>, vector<8x32xf32>
      tpu.vector_store %arg7[%c0_20, %c0_21], %26 {strides = array<i32>} : memref<8x32xf32, #tpu.memory_space<vmem>>, vector<8x32xf32>,
    } else {
    }
    return
  }
  func.func @transform_0(%arg0: i32, %arg1: i32) -> (i32, i32) {
    %c0_i32 = arith.constant 0 : i32
    %c0_i32_0 = arith.constant 0 : i32
    return %arg0, %c0_i32 : i32, i32
  }
  func.func @transform_1(%arg0: i32, %arg1: i32) -> (i32, i32) {
    %c0_i32 = arith.constant 0 : i32
    %c0_i32_0 = arith.constant 0 : i32
    return %c0_i32, %arg1 : i32, i32
  }
  func.func @transform_2(%arg0: i32, %arg1: i32) -> (i32, i32) {
    %c0_i32 = arith.constant 0 : i32
    %c0_i32_0 = arith.constant 0 : i32
    return %c0_i32, %arg1 : i32, i32
  }
  func.func @transform_3(%arg0: i32, %arg1: i32) -> (i32, i32) {
    %c0_i32 = arith.constant 0 : i32
    %c0_i32_0 = arith.constant 0 : i32
    return %arg1, %c0_i32 : i32, i32
  }
  func.func @transform_4(%arg0: i32, %arg1: i32) -> (i32, i32) {
    %c0_i32 = arith.constant 0 : i32
    %c0_i32_0 = arith.constant 0 : i32
    %c0_i32_1 = arith.constant 0 : i32
    return %c0_i32, %c0_i32_0 : i32, i32
  }
  func.func @transform_5(%arg0: i32, %arg1: i32) -> (i32, i32) {
    %c0_i32 = arith.constant 0 : i32
    %c0_i32_0 = arith.constant 0 : i32
    return %arg0, %c0_i32 : i32, i32
  }
}

module attributes {stable_mosaic.version = 11 : i64} {
  func.func @_clip_vision_projection_kernel(%arg0: i32, %arg1: i32, %arg2: memref<8x32xf32, #tpu.memory_space<vmem>>, %arg3: memref<32x96xf32, #tpu.memory_space<vmem>>, %arg4: memref<1x96xf32, #tpu.memory_space<vmem>>, %arg5: memref<96x32xf32, #tpu.memory_space<vmem>>, %arg6: memref<1x32xf32, #tpu.memory_space<vmem>>, %arg7: memref<8x32xf32, #tpu.memory_space<vmem>>, %arg8: memref<8x32xf32, #tpu.memory_space<vmem>>) attributes {dimension_semantics = [#tpu.dimension_semantics<parallel>, #tpu.dimension_semantics<arbitrary>], iteration_bounds = array<i64: 2, 1>, scalar_prefetch = 0 : i64, scratch_operands = 1 : i64, tpu.core_type = #tpu.core_type<tc>, window_params = [{transform_indices = @transform_0, window_bounds = array<i64: 8, 32>}, {transform_indices = @transform_1, window_bounds = array<i64: 32, 96>}, {transform_indices = @transform_2, window_bounds = array<i64: 1, 96>}, {transform_indices = @transform_3, window_bounds = array<i64: 96, 32>}, {pipeline_mode = #tpu.pipeline_mode<synchronous>, transform_indices = @transform_4, window_bounds = array<i64: 1, 32>}, {transform_indices = @transform_5, window_bounds = array<i64: 8, 32>}]} {
    %c0_i32 = arith.constant 0 : i32
    %0 = arith.cmpi eq, %arg1, %c0_i32 : i32
    %1 = arith.extui %0 : i1 to i32
    %c0_i32_0 = arith.constant 0 : i32
    %2 = arith.cmpi ne, %1, %c0_i32_0 : i32
    scf.if %2 {
      %cst_16 = arith.constant 0.000000e+00 : f32
      %23 = vector.broadcast %cst_16 : f32 to vector<8x32xf32>
      %c0_17 = arith.constant 0 : index
      %c0_18 = arith.constant 0 : index
      %24 = vector.load %arg8[%c0_17, %c0_18] : memref<8x32xf32, #tpu.memory_space<vmem>>, vector<8x32xf32>
      tpu.vector_store %arg8[%c0_17, %c0_18], %23 {strides = array<i32>} : memref<8x32xf32, #tpu.memory_space<vmem>>, vector<8x32xf32>,
    } else {
    }
    %c0 = arith.constant 0 : index
    %c0_1 = arith.constant 0 : index
    %3 = vector.load %arg2[%c0, %c0_1] : memref<8x32xf32, #tpu.memory_space<vmem>>, vector<8x32xf32>
    %c0_2 = arith.constant 0 : index
    %c0_3 = arith.constant 0 : index
    %4 = vector.load %arg3[%c0_2, %c0_3] : memref<32x96xf32, #tpu.memory_space<vmem>>, vector<32x96xf32>
    %cst = arith.constant dense<0.000000e+00> : vector<8x96xf32>
    %5 = tpu.matmul %3, %4, %cst {dimension_numbers = #tpu.dot_dimension_numbers<[1], [0], [0], [1], [0, 0, 1, 1], [], []>} : vector<8x32xf32>, vector<32x96xf32>, vector<8x96xf32> -> vector<8x96xf32>
    %c0_4 = arith.constant 0 : index
    %c0_5 = arith.constant 0 : index
    %6 = vector.load %arg4[%c0_4, %c0_5] : memref<1x96xf32, #tpu.memory_space<vmem>>, vector<1x96xf32>
    %7 = vector.broadcast %6 : vector<1x96xf32> to vector<8x96xf32>
    %8 = arith.addf %5, %7 : vector<8x96xf32>
    %9 = arith.negf %8 : vector<8x96xf32>
    %10 = math.exp %9 : vector<8x96xf32>
    %cst_6 = arith.constant 1.000000e+00 : f32
    %11 = vector.broadcast %cst_6 : f32 to vector<8x96xf32>
    %12 = arith.addf %11, %10 : vector<8x96xf32>
    %13 = arith.divf %11, %12 : vector<8x96xf32>
    %14 = arith.mulf %8, %13 : vector<8x96xf32>
    %c0_7 = arith.constant 0 : index
    %c0_8 = arith.constant 0 : index
    %15 = vector.load %arg8[%c0_7, %c0_8] : memref<8x32xf32, #tpu.memory_space<vmem>>, vector<8x32xf32>
    %c0_9 = arith.constant 0 : index
    %c0_10 = arith.constant 0 : index
    %16 = vector.load %arg5[%c0_9, %c0_10] : memref<96x32xf32, #tpu.memory_space<vmem>>, vector<96x32xf32>
    %cst_11 = arith.constant dense<0.000000e+00> : vector<8x32xf32>
    %17 = tpu.matmul %14, %16, %cst_11 {dimension_numbers = #tpu.dot_dimension_numbers<[1], [0], [0], [1], [0, 0, 1, 1], [], []>} : vector<8x96xf32>, vector<96x32xf32>, vector<8x32xf32> -> vector<8x32xf32>
    %18 = arith.addf %15, %17 : vector<8x32xf32>
    %c0_12 = arith.constant 0 : index
    %c0_13 = arith.constant 0 : index
    %19 = vector.load %arg8[%c0_12, %c0_13] : memref<8x32xf32, #tpu.memory_space<vmem>>, vector<8x32xf32>
    tpu.vector_store %arg8[%c0_12, %c0_13], %18 {strides = array<i32>} : memref<8x32xf32, #tpu.memory_space<vmem>>, vector<8x32xf32>,
    %c0_i32_14 = arith.constant 0 : i32
    %20 = arith.cmpi eq, %arg1, %c0_i32_14 : i32
    %21 = arith.extui %20 : i1 to i32
    %c0_i32_15 = arith.constant 0 : i32
    %22 = arith.cmpi ne, %21, %c0_i32_15 : i32
    scf.if %22 {
      %c0_16 = arith.constant 0 : index
      %c0_17 = arith.constant 0 : index
      %23 = vector.load %arg8[%c0_16, %c0_17] : memref<8x32xf32, #tpu.memory_space<vmem>>, vector<8x32xf32>
      %c0_18 = arith.constant 0 : index
      %c0_19 = arith.constant 0 : index
      %24 = vector.load %arg6[%c0_18, %c0_19] : memref<1x32xf32, #tpu.memory_space<vmem>>, vector<1x32xf32>
      %25 = vector.broadcast %24 : vector<1x32xf32> to vector<8x32xf32>
      %26 = arith.addf %23, %25 : vector<8x32xf32>
      %c0_20 = arith.constant 0 : index
      %c0_21 = arith.constant 0 : index
      %27 = vector.load %arg7[%c0_20, %c0_21] : memref<8x32xf32, #tpu.memory_space<vmem>>, vector<8x32xf32>
      tpu.vector_store %arg7[%c0_20, %c0_21], %26 {strides = array<i32>} : memref<8x32xf32, #tpu.memory_space<vmem>>, vector<8x32xf32>,
    } else {
    }
    return
  }
  func.func @transform_0(%arg0: i32, %arg1: i32) -> (i32, i32) {
    %c0_i32 = arith.constant 0 : i32
    %c0_i32_0 = arith.constant 0 : i32
    return %arg0, %c0_i32 : i32, i32
  }
  func.func @transform_1(%arg0: i32, %arg1: i32) -> (i32, i32) {
    %c0_i32 = arith.constant 0 : i32
    %c0_i32_0 = arith.constant 0 : i32
    return %c0_i32, %arg1 : i32, i32
  }
  func.func @transform_2(%arg0: i32, %arg1: i32) -> (i32, i32) {
    %c0_i32 = arith.constant 0 : i32
    %c0_i32_0 = arith.constant 0 : i32
    return %c0_i32, %arg1 : i32, i32
  }
  func.func @transform_3(%arg0: i32, %arg1: i32) -> (i32, i32) {
    %c0_i32 = arith.constant 0 : i32
    %c0_i32_0 = arith.constant 0 : i32
    return %arg1, %c0_i32 : i32, i32
  }
  func.func @transform_4(%arg0: i32, %arg1: i32) -> (i32, i32) {
    %c0_i32 = arith.constant 0 : i32
    %c0_i32_0 = arith.constant 0 : i32
    %c0_i32_1 = arith.constant 0 : i32
    return %c0_i32, %c0_i32_0 : i32, i32
  }
  func.func @transform_5(%arg0: i32, %arg1: i32) -> (i32, i32) {
    %c0_i32 = arith.constant 0 : i32
    %c0_i32_0 = arith.constant 0 : i32
    return %arg0, %c0_i32 : i32, i32
  }
}

</mosaic_0001>

<bundles_post_ra>
// kernel: tpu_custom_call.1
= control target key start
LH: loop header
LB: loop body
LE: loop exit
PB: predicated region body
PF: predicated region fallthrough
CT: control target
= control target key end

     0   :  { %10 = vsyncpa [#allocation4], 0  ;;  %s1054_s0 = inlined_call_operand.vmem [shape: f32[16,32], index: 0, kind: input, shape index: {}]   ;;  %s1055_s1 = inlined_call_operand.vmem [shape: f32[32,96], index: 1, kind: input, shape index: {}]   ;;  %s1056_s2 = inlined_call_operand.vmem [shape: f32[1,96], index: 2, kind: input, shape index: {}]   ;;  %s1057_s3 = inlined_call_operand.vmem [shape: f32[96,32], index: 3, kind: input, shape index: {}]   ;;  %s1058_s4 = inlined_call_operand.vmem [shape: f32[1,32], index: 4, kind: input, shape index: {}]   ;;  %s1059_s5 = inlined_call_operand.hbm [shape: f32[16,32], index: 5, kind: output, shape index: {}]  }
   0x1   :  { %12 = vsyncpa [#allocation4 + $0x1], 0  ;;  %s884_s18 = smov 0   ;;  %s886_s19 = smov 0  }
   0x2   :  { %s888_s20 = smov 0   ;;  %s890_s21 = smov 0  }
   0x3   :  { %s892_s22 = smov 0   ;;  %s894_s23 = smov 0  }
   0x4 LB: > { %s609_s24 = sadd.s32 4294967295, %s848_s23   ;;  %s610_s25 = sadd.s32 4294967294, %s848_s23   ;;  %s848_s23 = sphi %s894_s23, %s18_s23   ;;  %s844_s22 = sphi %s892_s22, %s1066_s22   ;;  %s840_s21 = sphi %s890_s21, %s1065_s21   ;;  %s836_s20 = sphi %s888_s20, %s1064_s20   ;;  %s832_s19 = sphi %s886_s19, %s1063_s19   ;;  %s828_s18 = sphi %s884_s18, %s1062_s18  }
   0x5   : > { %s30_s26 = sadd.s32 1, %s844_s22  ;;  %s162_s27 = sadd.s32 1, %s836_s20 }
   0x6   : > { %p32_p0 = scmp.ge.s32.totalorder %s30_s26, 2  ;;  %p172_p1 = scmp.ne.s32.totalorder %s836_s20, %s832_s19 }
   0x7   : > { %p173_p2 = scmp.eq.s32.totalorder %s609_s24, 1  ;;  %p178_p3 = scmp.ne.s32.totalorder %s832_s19, %s828_s18 }
   0x8   : > { %s1068_s26 = smov (%p32_p0, %s30_s26), 0  ;;  %p179_p5 = scmp.eq.s32.totalorder %s610_s25, 1 }
   0x9   : > { %p924_p4 = por %p173_p2, %p172_p1  ;;  %s159_s29 = ssub.s32 %s844_s22, %s1068_s26 }
   0xa   : > { %p616_p6 = scmp.ge.s32.totalorder %s848_s23, 1  ;;  %p160_p7 = scmp.eq.s32.totalorder %s159_s29, 0 }
   0xb   : > { %p931_p8 = por %p179_p5, %p178_p3  ;;  %p229_p9 = scmp.lt.s32.totalorder %s848_s23, 3 }
   0xc   : > { %s937_s6 = scalar_select %p160_p7, %s836_s20, %s162_s27  }
   0xd   : > { %p230_p10 = pnand %p616_p6, %p229_p9 }
   0xe   : > { %v292_v0 = vld [vmem:[%s1055_s1] sm:$0xff] (!%p230_p10)  ;;  %v293_v1 = vld [vmem:[%s1055_s1 + $0x8] sm:$0xff] (!%p230_p10)  ;;  %v294_v2 = vld [vmem:[%s1055_s1 + $0x10] sm:$0xff] (!%p230_p10)  ;;  %v850_v3 = vmov (!%p230_p10), 0.0|0.0   ;;  %vm851_vm0 = vmmov (!%p230_p10), 0   ;;  %v852_v6 = vmov (!%p230_p10), 0.0  }
   0xf   : > { %233 = sbr.rel (%p230_p10) target bundleno = 507 (0x1fb), region = 40  ;;  %684 = vmatprep.subr.bf16.mxu0 (!%p230_p10), %v850_v3  ;;  %v685_v4 = vpack.c.bf16 (!%p230_p10), %v293_v1, %v292_v0  ;;  %v295_v5 = vld [vmem:[%s1055_s1 + $0x18] sm:$0xff] (!%p230_p10)  ;;  %654 = vmatprep.mubr.msk.f32.mxu0 (!%p230_p10), %vm851_vm0, %v852_v6  ;;  %p268_p11 = scmp.lt.s32.totalorder (!%p230_p10), %s840_s21, 1  ;;  %vm289_vm1 = vcmask (!%p230_p10), 261120   ;;  %v385_v9 = vld [vmem:[%s1057_s3] sm:$0xff] (!%p230_p10)  ;;  %v386_v10 = vld [vmem:[%s1057_s3 + $0x8] sm:$0xff] (!%p230_p10) }
  0x10   : > { %290 = vst.msk [vmem:[#allocation2] sm:$0xff] (!%p230_p10), %vm289_vm1, %v852_v6  ;;  %690 = vmatprep.subr.bf16.mxu1 (!%p230_p10), %v850_v3  ;;  %681 = vmatprep.mubr.msk.f32.mxu1 (!%p230_p10), %vm851_vm0, %v852_v6  ;;  %v688_v7 = vpack.c.bf16 (!%p230_p10), %v295_v5, %v294_v2  ;;  %v691_v11 = vpack.c.bf16 (!%p230_p10), %v386_v10, %v385_v9  ;;  %v387_v12 = vld [vmem:[%s1057_s3 + $0x10] sm:$0xff] (!%p230_p10)  ;;  %v388_v13 = vld [vmem:[%s1057_s3 + $0x18] sm:$0xff] (!%p230_p10)  ;;  %v389_v15 = vld [vmem:[%s1057_s3 + $0x20] sm:$0xff] (!%p230_p10)  ;;  %vm397_vm2 = vcmask (!%p230_p10), 785408   ;;  %s625_s27 = sshll.u32 (!%p230_p10), %s840_s21, 7 }
  0x11   : > { %686 = vmatpush3.bf16.msra.mxu0 (!%p230_p10), %v685_v4  ;;  %v694_v14 = vpack.c.bf16 (!%p230_p10), %v388_v13, %v387_v12  ;;  %v390_v16 = vld [vmem:[%s1057_s3 + $0x28] sm:$0xff] (!%p230_p10)  ;;  %v391_v18 = vld [vmem:[%s1057_s3 + $0x30] sm:$0xff] (!%p230_p10)  ;;  %v392_v19 = vld [vmem:[%s1057_s3 + $0x38] sm:$0xff] (!%p230_p10)  ;;  %s1006_s10 = scalar_lea.hbm (!%p230_p10), %s1059_s5, %s625_s27 }
  0x12   : > { %687 = vmatprep.subr.bf16.mxu0 (!%p230_p10), %v850_v3  ;;  %692 = vmatpush3.bf16.msra.mxu1 (!%p230_p10), %v691_v11  ;;  %v697_v17 = vpack.c.bf16 (!%p230_p10), %v390_v16, %v389_v15  ;;  %v700_v20 = vpack.c.bf16 (!%p230_p10), %v392_v19, %v391_v18  ;;  %v393_v21 = vld [vmem:[%s1057_s3 + $0x40] sm:$0xff] (!%p230_p10)  ;;  %v394_v22 = vld [vmem:[%s1057_s3 + $0x48] sm:$0xff] (!%p230_p10)  ;;  %v395_v24 = vld [vmem:[%s1057_s3 + $0x50] sm:$0xff] (!%p230_p10) }
  0x13   : > { %693 = vmatprep.subr.bf16.mxu1 (!%p230_p10), %v850_v3  ;;  %v703_v23 = vpack.c.bf16 (!%p230_p10), %v394_v22, %v393_v21  ;;  %v396_v25 = vld [vmem:[%s1057_s3 + $0x58] sm:$0xff] (!%p230_p10)  ;;  %v619_v27 = vld [vmem:[%s1056_s2] ss:$0 sm:$0xff] (!%p230_p10) }
  0x14   : > { %v706_v26 = vpack.c.bf16 (!%p230_p10), %v396_v25, %v395_v24  ;;  %v623_v40 = vld [vmem:[%s1058_s4] ss:$0 sm:$0xff] (!%p230_p10) }
  0x15   : > { %689 = vmatpush3.bf16.msra.mxu0 (!%p230_p10), %v688_v7 }
  0x16   : > { %s269_s15 = scalar_select %p268_p11, %s840_s21, 1  ;;  %695 = vmatpush3.bf16.msra.mxu1 %v694_v14 }
  0x17   : > { %696 = vmatprep.subr.bf16.mxu1 %v850_v3  ;;  %v384_v36 = vld [vmem:[#allocation2] sm:$0xff]  ;;  %s853_s21 = smov [#allocation3]  }
  0x18   : > { %s618_s16 = sshll.u32 %s269_s15, 3  ;;  %s774_s13 = sshll.u32 %s853_s21, 4  ;;  %s775_s13 = int_to_ptr.vmem [resolvable:$false] %s774_s13 }
  0x19   : > { %s271_s25 = scalar_lea.vmem %s1054_s0, %s618_s16  ;;  %s265_s16 = sand.u32 1, %s832_s19  }
  0x1a   : > { %v291_v8 = vld [vmem:[%s271_s25] sm:$0xff]  ;;  %698 = vmatpush3.bf16.msra.mxu1 %v697_v17  ;;  %s617_s17 = sshll.u32 %s265_s16, 3  ;;  %s487_s11 = scalar_lea.sflag [#allocation4], %s265_s16 }
  0x1b   : > { %655 = vmatmul.mubr.msk.f32.vlgmr.msra.gmra.mrb[0].mxu0 %vm289_vm1, %v291_v8  ;;  %699 = vmatprep.subr.bf16.mxu1 %v850_v3  ;;  %s267_s29 = scalar_lea.vmem [#allocation3], %s617_s17  ;;  %s776_s14 = scalar_lea.vmem %s775_s13, 256 }
  0x1c   : > { %s500_s7 = sshll.u32 %s267_s29, 4  ;;  %s1008_s7 = int_to_ptr.vmem [resolvable:$true] %s500_s7 }
  0x1d   : > { %s770_s12 = scalar_lea.vmem %s1008_s7, 128  ;;  %p777_p1 = scmp.lt.s32.totalorder %s1008_s7, %s775_s13 }
  0x1e   : > { %701 = vmatpush3.bf16.msra.mxu1 %v700_v20  ;;  %p771_p12 = scmp.ne.s32.totalorder %s1008_s7, %s770_s12  ;;  %p778_p2 = scmp.lt.s32.totalorder %s776_s14, %s770_s12 }
  0x1f   : > { %702 = vmatprep.subr.bf16.mxu1 %v850_v3 }
  0x20   : > { %p772_p13 = pnand %p771_p12, %p924_p4  ;;  %p779_p3 = por %p778_p2, %p777_p1 }
  0x22   : > { %704 = vmatpush3.bf16.msra.mxu1 %v703_v23  ;;  %p773_p0 = pneg %p772_p13 }
  0x23   : > { %705 = vmatprep.subr.bf16.mxu1 %v850_v3 }
  0x24   : > { %p780_p5 = pnand %p779_p3, %p773_p0 }
  0x26   : > { %707 = vmatpush3.bf16.msra.mxu1 %v706_v26 }
  0xee   : > { %v373_v28 = vpop.f32.mrb[0].mxu0 }
  0xef   : > { %v374_v29 = vadd.f32 %v619_v27, %v373_v28  ;;  %v656_v30 = vpop.f32.mrb[1].mxu0 }
  0xf1   : > { %v621_v31 = vmul.f32 -1.442695, %v374_v29 }
  0xf3   : > { %766 = vpow2.f32 %v621_v31 }
  0xfd   : > { %v767_v32 = vpop.eup %766 }
  0xfe   : > { %v380_v33 = vadd.f32 1.0, %v767_v32 }
 0x100   : > { %768 = vrcp.f32 %v380_v33 }
 0x10a   : > { %v769_v34 = vpop.eup %768 }
 0x10b   : > { %v383_v35 = vmul.f32 %v769_v34, %v374_v29 }
 0x10d   : > { %682 = vmatmul.mubr.msk.f32.vlgmr.msra.gmra.mrb[0].mxu1 %vm397_vm2, %v383_v35 }
 0x1e0   : > { %v467_v37 = vpop.f32.mrb[0].mxu1 }
 0x1e1   : > { %v471_v38 = vadd.f32 %v467_v37, %v384_v36  ;;  %v683_v39 = vpop.f32.mrb[1].mxu1 }
 0x1e3   : > { %472 = vst.msk [vmem:[#allocation2] sm:$0xff] %vm289_vm1, %v471_v38 }
 0x1ea   : > { %v476_v41 = vld [vmem:[#allocation2] sm:$0xff] }
 0x1eb   : > { %v484_v42 = vadd.f32 %v623_v40, %v476_v41 }
 0x1ed   : > { %485 = vst.msk [vmem:[%s267_s29] sm:$0xff] %vm289_vm1, %v484_v42 }
 0x1ee   : > { %783 = shalt.err (!%p780_p5)
}
 0x1ef   : > { %s784_s15 = scalar_lea.hbm %s1006_s10, 128  ;;  %s788_s24 = scalar_lea.hbm %s1059_s5, 256 }
 0x1f0   : > { %p785_p6 = scmp.ne.s32.totalorder %s1006_s10, %s784_s15  ;;  %p789_p10 = scmp.lt.u32.totalorder %s1006_s10, %s1059_s5 }
 0x1f1   : > { %p790_p11 = scmp.lt.u32.totalorder %s788_s24, %s784_s15  ;;  %p792_p13 = scmp.lt.u32.totalorder %s784_s15, %s1006_s10 }
 0x1f2   : > { %p786_p7 = pnand %p785_p6, %p924_p4 }
 0x1f3   : > { %p791_p12 = por %p790_p11, %p789_p10 }
 0x1f4   : > { %p787_p9 = pneg %p786_p7 }
 0x1f5   : > { %p793_p0 = por %p792_p13, %p791_p12 }
 0x1f7   : > { %p794_p1 = pnand %p793_p0, %p787_p9 }
 0x1f9   : > { %797 = shalt.err (!%p794_p1)
}
 0x1fa   : > { %708 = dma.vmem_to_hbm [thread:$0]  (%p924_p4), %s1008_s7, 128, %s1006_s10, %s487_s11  }
 0x1fb PF: > { %p714_p2 = scmp.ge.s32.totalorder %s848_s23, 2  ;;  %s512_s29 = sand.u32 1, %s828_s18  }
 0x1fc   : > { %s513_s8 = scalar_lea.sflag [#allocation4], %s512_s29 }
 0x1fd   : > { %p711_p3 = pnand %p714_p2, %p931_p8 }
 0x1ff   : > { %823 = dma.done.wait (!%p711_p3), %s513_s8, 128  }
 0x200   : > { %825 = vsyncadd (!%p711_p3), %s513_s8, 4294967168  ;;  %s18_s23 = sadd.s32 1, %s848_s23   ;;  %s1062_s18 = smov %s832_s19 }
 0x201   : > { %p15_p5 = scmp.ge.s32.totalorder %s18_s23, 4   ;;  %s1063_s19 = smov %s836_s20 }
 0x202   : > { %s1064_s20 = smov %s937_s6  ;;  %s1065_s21 = smov %s844_s22 }
 0x203   : > { %s1066_s22 = smov %s1068_s26  ;;  %17 = sbr.rel (!%p15_p5) target bundleno = 4 (0x4), region = 92 }
 0x20a   :  { %518 = vsyncpa [#allocation4], 1 }
 0x20b   :  { %520 = vsyncpa [#allocation4 + $0x1], 1 }

// kernel: tpu_custom_call.1
= control target key start
LH: loop header
LB: loop body
LE: loop exit
PB: predicated region body
PF: predicated region fallthrough
CT: control target
= control target key end

     0   :  { %10 = vsyncpa [#allocation4], 0  ;;  %s1054_s0 = inlined_call_operand.vmem [shape: f32[16,32], index: 0, kind: input, shape index: {}]   ;;  %s1055_s1 = inlined_call_operand.vmem [shape: f32[32,96], index: 1, kind: input, shape index: {}]   ;;  %s1056_s2 = inlined_call_operand.vmem [shape: f32[1,96], index: 2, kind: input, shape index: {}]   ;;  %s1057_s3 = inlined_call_operand.vmem [shape: f32[96,32], index: 3, kind: input, shape index: {}]   ;;  %s1058_s4 = inlined_call_operand.vmem [shape: f32[1,32], index: 4, kind: input, shape index: {}]   ;;  %s1059_s5 = inlined_call_operand.hbm [shape: f32[16,32], index: 5, kind: output, shape index: {}]  }
   0x1   :  { %12 = vsyncpa [#allocation4 + $0x1], 0  ;;  %s884_s18 = smov 0   ;;  %s886_s19 = smov 0  }
   0x2   :  { %s888_s20 = smov 0   ;;  %s890_s21 = smov 0  }
   0x3   :  { %s892_s22 = smov 0   ;;  %s894_s23 = smov 0  }
   0x4 LB: > { %s609_s24 = sadd.s32 4294967295, %s848_s23   ;;  %s610_s25 = sadd.s32 4294967294, %s848_s23   ;;  %s848_s23 = sphi %s894_s23, %s18_s23   ;;  %s844_s22 = sphi %s892_s22, %s1066_s22   ;;  %s840_s21 = sphi %s890_s21, %s1065_s21   ;;  %s836_s20 = sphi %s888_s20, %s1064_s20   ;;  %s832_s19 = sphi %s886_s19, %s1063_s19   ;;  %s828_s18 = sphi %s884_s18, %s1062_s18  }
   0x5   : > { %s30_s26 = sadd.s32 1, %s844_s22  ;;  %s162_s27 = sadd.s32 1, %s836_s20 }
   0x6   : > { %p32_p0 = scmp.ge.s32.totalorder %s30_s26, 2  ;;  %p172_p1 = scmp.ne.s32.totalorder %s836_s20, %s832_s19 }
   0x7   : > { %p173_p2 = scmp.eq.s32.totalorder %s609_s24, 1  ;;  %p178_p3 = scmp.ne.s32.totalorder %s832_s19, %s828_s18 }
   0x8   : > { %s1068_s26 = smov (%p32_p0, %s30_s26), 0  ;;  %p179_p5 = scmp.eq.s32.totalorder %s610_s25, 1 }
   0x9   : > { %p924_p4 = por %p173_p2, %p172_p1  ;;  %s159_s29 = ssub.s32 %s844_s22, %s1068_s26 }
   0xa   : > { %p616_p6 = scmp.ge.s32.totalorder %s848_s23, 1  ;;  %p160_p7 = scmp.eq.s32.totalorder %s159_s29, 0 }
   0xb   : > { %p931_p8 = por %p179_p5, %p178_p3  ;;  %p229_p9 = scmp.lt.s32.totalorder %s848_s23, 3 }
   0xc   : > { %s937_s6 = scalar_select %p160_p7, %s836_s20, %s162_s27  }
   0xd   : > { %p230_p10 = pnand %p616_p6, %p229_p9 }
   0xe   : > { %v292_v0 = vld [vmem:[%s1055_s1] sm:$0xff] (!%p230_p10)  ;;  %v293_v1 = vld [vmem:[%s1055_s1 + $0x8] sm:$0xff] (!%p230_p10)  ;;  %v294_v2 = vld [vmem:[%s1055_s1 + $0x10] sm:$0xff] (!%p230_p10)  ;;  %v850_v3 = vmov (!%p230_p10), 0.0|0.0   ;;  %vm851_vm0 = vmmov (!%p230_p10), 0   ;;  %v852_v6 = vmov (!%p230_p10), 0.0  }
   0xf   : > { %233 = sbr.rel (%p230_p10) target bundleno = 507 (0x1fb), region = 40  ;;  %684 = vmatprep.subr.bf16.mxu0 (!%p230_p10), %v850_v3  ;;  %v685_v4 = vpack.c.bf16 (!%p230_p10), %v293_v1, %v292_v0  ;;  %v295_v5 = vld [vmem:[%s1055_s1 + $0x18] sm:$0xff] (!%p230_p10)  ;;  %654 = vmatprep.mubr.msk.f32.mxu0 (!%p230_p10), %vm851_vm0, %v852_v6  ;;  %p268_p11 = scmp.lt.s32.totalorder (!%p230_p10), %s840_s21, 1  ;;  %vm289_vm1 = vcmask (!%p230_p10), 261120   ;;  %v385_v9 = vld [vmem:[%s1057_s3] sm:$0xff] (!%p230_p10)  ;;  %v386_v10 = vld [vmem:[%s1057_s3 + $0x8] sm:$0xff] (!%p230_p10) }
  0x10   : > { %290 = vst.msk [vmem:[#allocation2] sm:$0xff] (!%p230_p10), %vm289_vm1, %v852_v6  ;;  %690 = vmatprep.subr.bf16.mxu1 (!%p230_p10), %v850_v3  ;;  %681 = vmatprep.mubr.msk.f32.mxu1 (!%p230_p10), %vm851_vm0, %v852_v6  ;;  %v688_v7 = vpack.c.bf16 (!%p230_p10), %v295_v5, %v294_v2  ;;  %v691_v11 = vpack.c.bf16 (!%p230_p10), %v386_v10, %v385_v9  ;;  %v387_v12 = vld [vmem:[%s1057_s3 + $0x10] sm:$0xff] (!%p230_p10)  ;;  %v388_v13 = vld [vmem:[%s1057_s3 + $0x18] sm:$0xff] (!%p230_p10)  ;;  %v389_v15 = vld [vmem:[%s1057_s3 + $0x20] sm:$0xff] (!%p230_p10)  ;;  %vm397_vm2 = vcmask (!%p230_p10), 785408   ;;  %s625_s27 = sshll.u32 (!%p230_p10), %s840_s21, 7 }
  0x11   : > { %686 = vmatpush3.bf16.msra.mxu0 (!%p230_p10), %v685_v4  ;;  %v694_v14 = vpack.c.bf16 (!%p230_p10), %v388_v13, %v387_v12  ;;  %v390_v16 = vld [vmem:[%s1057_s3 + $0x28] sm:$0xff] (!%p230_p10)  ;;  %v391_v18 = vld [vmem:[%s1057_s3 + $0x30] sm:$0xff] (!%p230_p10)  ;;  %v392_v19 = vld [vmem:[%s1057_s3 + $0x38] sm:$0xff] (!%p230_p10)  ;;  %s1006_s10 = scalar_lea.hbm (!%p230_p10), %s1059_s5, %s625_s27 }
  0x12   : > { %687 = vmatprep.subr.bf16.mxu0 (!%p230_p10), %v850_v3  ;;  %692 = vmatpush3.bf16.msra.mxu1 (!%p230_p10), %v691_v11  ;;  %v697_v17 = vpack.c.bf16 (!%p230_p10), %v390_v16, %v389_v15  ;;  %v700_v20 = vpack.c.bf16 (!%p230_p10), %v392_v19, %v391_v18  ;;  %v393_v21 = vld [vmem:[%s1057_s3 + $0x40] sm:$0xff] (!%p230_p10)  ;;  %v394_v22 = vld [vmem:[%s1057_s3 + $0x48] sm:$0xff] (!%p230_p10)  ;;  %v395_v24 = vld [vmem:[%s1057_s3 + $0x50] sm:$0xff] (!%p230_p10) }
  0x13   : > { %693 = vmatprep.subr.bf16.mxu1 (!%p230_p10), %v850_v3  ;;  %v703_v23 = vpack.c.bf16 (!%p230_p10), %v394_v22, %v393_v21  ;;  %v396_v25 = vld [vmem:[%s1057_s3 + $0x58] sm:$0xff] (!%p230_p10)  ;;  %v619_v27 = vld [vmem:[%s1056_s2] ss:$0 sm:$0xff] (!%p230_p10) }
  0x14   : > { %v706_v26 = vpack.c.bf16 (!%p230_p10), %v396_v25, %v395_v24  ;;  %v623_v40 = vld [vmem:[%s1058_s4] ss:$0 sm:$0xff] (!%p230_p10) }
  0x15   : > { %689 = vmatpush3.bf16.msra.mxu0 (!%p230_p10), %v688_v7 }
  0x16   : > { %s269_s15 = scalar_select %p268_p11, %s840_s21, 1  ;;  %695 = vmatpush3.bf16.msra.mxu1 %v694_v14 }
  0x17   : > { %696 = vmatprep.subr.bf16.mxu1 %v850_v3  ;;  %v384_v36 = vld [vmem:[#allocation2] sm:$0xff]  ;;  %s853_s21 = smov [#allocation3]  }
  0x18   : > { %s618_s16 = sshll.u32 %s269_s15, 3  ;;  %s774_s13 = sshll.u32 %s853_s21, 4  ;;  %s775_s13 = int_to_ptr.vmem [resolvable:$false] %s774_s13 }
  0x19   : > { %s271_s25 = scalar_lea.vmem %s1054_s0, %s618_s16  ;;  %s265_s16 = sand.u32 1, %s832_s19  }
  0x1a   : > { %v291_v8 = vld [vmem:[%s271_s25] sm:$0xff]  ;;  %698 = vmatpush3.bf16.msra.mxu1 %v697_v17  ;;  %s617_s17 = sshll.u32 %s265_s16, 3  ;;  %s487_s11 = scalar_lea.sflag [#allocation4], %s265_s16 }
  0x1b   : > { %655 = vmatmul.mubr.msk.f32.vlgmr.msra.gmra.mrb[0].mxu0 %vm289_vm1, %v291_v8  ;;  %699 = vmatprep.subr.bf16.mxu1 %v850_v3  ;;  %s267_s29 = scalar_lea.vmem [#allocation3], %s617_s17  ;;  %s776_s14 = scalar_lea.vmem %s775_s13, 256 }
  0x1c   : > { %s500_s7 = sshll.u32 %s267_s29, 4  ;;  %s1008_s7 = int_to_ptr.vmem [resolvable:$true] %s500_s7 }
  0x1d   : > { %s770_s12 = scalar_lea.vmem %s1008_s7, 128  ;;  %p777_p1 = scmp.lt.s32.totalorder %s1008_s7, %s775_s13 }
  0x1e   : > { %701 = vmatpush3.bf16.msra.mxu1 %v700_v20  ;;  %p771_p12 = scmp.ne.s32.totalorder %s1008_s7, %s770_s12  ;;  %p778_p2 = scmp.lt.s32.totalorder %s776_s14, %s770_s12 }
  0x1f   : > { %702 = vmatprep.subr.bf16.mxu1 %v850_v3 }
  0x20   : > { %p772_p13 = pnand %p771_p12, %p924_p4  ;;  %p779_p3 = por %p778_p2, %p777_p1 }
  0x22   : > { %704 = vmatpush3.bf16.msra.mxu1 %v703_v23  ;;  %p773_p0 = pneg %p772_p13 }
  0x23   : > { %705 = vmatprep.subr.bf16.mxu1 %v850_v3 }
  0x24   : > { %p780_p5 = pnand %p779_p3, %p773_p0 }
  0x26   : > { %707 = vmatpush3.bf16.msra.mxu1 %v706_v26 }
  0xee   : > { %v373_v28 = vpop.f32.mrb[0].mxu0 }
  0xef   : > { %v374_v29 = vadd.f32 %v619_v27, %v373_v28  ;;  %v656_v30 = vpop.f32.mrb[1].mxu0 }
  0xf1   : > { %v621_v31 = vmul.f32 -1.442695, %v374_v29 }
  0xf3   : > { %766 = vpow2.f32 %v621_v31 }
  0xfd   : > { %v767_v32 = vpop.eup %766 }
  0xfe   : > { %v380_v33 = vadd.f32 1.0, %v767_v32 }
 0x100   : > { %768 = vrcp.f32 %v380_v33 }
 0x10a   : > { %v769_v34 = vpop.eup %768 }
 0x10b   : > { %v383_v35 = vmul.f32 %v769_v34, %v374_v29 }
 0x10d   : > { %682 = vmatmul.mubr.msk.f32.vlgmr.msra.gmra.mrb[0].mxu1 %vm397_vm2, %v383_v35 }
 0x1e0   : > { %v467_v37 = vpop.f32.mrb[0].mxu1 }
 0x1e1   : > { %v471_v38 = vadd.f32 %v467_v37, %v384_v36  ;;  %v683_v39 = vpop.f32.mrb[1].mxu1 }
 0x1e3   : > { %472 = vst.msk [vmem:[#allocation2] sm:$0xff] %vm289_vm1, %v471_v38 }
 0x1ea   : > { %v476_v41 = vld [vmem:[#allocation2] sm:$0xff] }
 0x1eb   : > { %v484_v42 = vadd.f32 %v623_v40, %v476_v41 }
 0x1ed   : > { %485 = vst.msk [vmem:[%s267_s29] sm:$0xff] %vm289_vm1, %v484_v42 }
 0x1ee   : > { %783 = shalt.err (!%p780_p5)
}
 0x1ef   : > { %s784_s15 = scalar_lea.hbm %s1006_s10, 128  ;;  %s788_s24 = scalar_lea.hbm %s1059_s5, 256 }
 0x1f0   : > { %p785_p6 = scmp.ne.s32.totalorder %s1006_s10, %s784_s15  ;;  %p789_p10 = scmp.lt.u32.totalorder %s1006_s10, %s1059_s5 }
 0x1f1   : > { %p790_p11 = scmp.lt.u32.totalorder %s788_s24, %s784_s15  ;;  %p792_p13 = scmp.lt.u32.totalorder %s784_s15, %s1006_s10 }
 0x1f2   : > { %p786_p7 = pnand %p785_p6, %p924_p4 }
 0x1f3   : > { %p791_p12 = por %p790_p11, %p789_p10 }
 0x1f4   : > { %p787_p9 = pneg %p786_p7 }
 0x1f5   : > { %p793_p0 = por %p792_p13, %p791_p12 }
 0x1f7   : > { %p794_p1 = pnand %p793_p0, %p787_p9 }
 0x1f9   : > { %797 = shalt.err (!%p794_p1)
}
 0x1fa   : > { %708 = dma.vmem_to_hbm [thread:$0]  (%p924_p4), %s1008_s7, 128, %s1006_s10, %s487_s11  }
 0x1fb PF: > { %p714_p2 = scmp.ge.s32.totalorder %s848_s23, 2  ;;  %s512_s29 = sand.u32 1, %s828_s18  }
 0x1fc   : > { %s513_s8 = scalar_lea.sflag [#allocation4], %s512_s29 }
 0x1fd   : > { %p711_p3 = pnand %p714_p2, %p931_p8 }
 0x1ff   : > { %823 = dma.done.wait (!%p711_p3), %s513_s8, 128  }
 0x200   : > { %825 = vsyncadd (!%p711_p3), %s513_s8, 4294967168  ;;  %s18_s23 = sadd.s32 1, %s848_s23   ;;  %s1062_s18 = smov %s832_s19 }
 0x201   : > { %p15_p5 = scmp.ge.s32.totalorder %s18_s23, 4   ;;  %s1063_s19 = smov %s836_s20 }
 0x202   : > { %s1064_s20 = smov %s937_s6  ;;  %s1065_s21 = smov %s844_s22 }
 0x203   : > { %s1066_s22 = smov %s1068_s26  ;;  %17 = sbr.rel (!%p15_p5) target bundleno = 4 (0x4), region = 92 }
 0x20a   :  { %518 = vsyncpa [#allocation4], 1 }
 0x20b   :  { %520 = vsyncpa [#allocation4 + $0x1], 1 }

</bundles_post_ra>
